<compile_context>
chip_gen: v5e
topology: v5e:2x2
jax: 0.10.0
libtpu: 0.0.40
codegen_flags: <defaults>
</compile_context>

<pallas_src>
import jax
import jax.numpy as jnp
from jax.experimental import pallas as pl
from jax.experimental.pallas import tpu as pltpu

# ---- static config (small synthetic shapes) ---------------------------------
B = 2            # batch
C = 3            # image channels
H = W = 16       # spatial
PATCH = 4        # patch size
S = (H // PATCH) * (W // PATCH)   # 16 patches ("sequence length")
PDIM = C * PATCH * PATCH          # 48 flattened patch features
D = 32           # hidden size of the synthetic backbone
NUM_CLASSES = 10
assert NUM_CLASSES <= D           # b_head / w_head are lane-padded into the slab

IMG_MEAN = 0.5         # processor normalization constants
INV_IMG_STD = 1.0 / 0.25
LN_EPS = 1e-6
INV_S = 1.0 / S
INV_B = 1.0 / B

# packed parameter slab layout (rows)
ROW_B_EMB, ROW_GAMMA, ROW_BETA, ROW_B_HEAD = 0, 1, 2, 3
VEC_ROWS = 8                       # vector params padded to a sublane-aligned block
W_EMB_ROW = VEC_ROWS               # rows  8..55 : w_emb  (PDIM, D)
W_HEAD_ROW = VEC_ROWS + PDIM       # rows 56..87 : w_head (D, D) lane-padded
SLAB_ROWS = VEC_ROWS + PDIM + D    # 88


def img_tune_kernel(tgt_ref, patches_ref, slab_ref, logits_ref, loss_ref):
    # --- processor: elementwise normalize (reciprocal-constant multiply) -----
    p = (patches_ref[...] - IMG_MEAN) * INV_IMG_STD            # (B*S, PDIM)

    # --- static slices of the single parameter slab (no extra DMAs) ----------
    b_emb = slab_ref[ROW_B_EMB:ROW_B_EMB + 1, :]               # (1, D)
    gamma = slab_ref[ROW_GAMMA:ROW_GAMMA + 1, :]               # (1, D)
    beta = slab_ref[ROW_BETA:ROW_BETA + 1, :]                  # (1, D)
    b_head = slab_ref[ROW_B_HEAD:ROW_B_HEAD + 1, :NUM_CLASSES]     # (1, NC)
    w_emb = slab_ref[W_EMB_ROW:W_EMB_ROW + PDIM, :]            # (PDIM, D)
    w_head = slab_ref[W_HEAD_ROW:W_HEAD_ROW + D, :NUM_CLASSES]     # (D, NC)

    # --- backbone: patch embedding (MXU matmul) + GELU + LayerNorm -----------
    h = jnp.dot(p, w_emb, preferred_element_type=jnp.float32) + b_emb   # (B*S, D)
    # TODO(synk): HF backbones with exact (erf) GELU will drift slightly vs the
    # tanh approximation used here.
    h = jax.nn.gelu(h, approximate=True)

    mu = jnp.mean(h, axis=-1, keepdims=True)
    var = jnp.mean((h - mu) * (h - mu), axis=-1, keepdims=True)
    hidden = (h - mu) * jax.lax.rsqrt(var + LN_EPS)
    hidden = hidden * gamma + beta                             # last_hidden_state rows

    # --- head: mean-pool over sequence -> linear ------------------------------
    # hidden stays 2-D; reduce the B static, sublane-aligned S-row slabs
    # directly (no 3-D reshape that could materialize a VMEM relayout copy).
    pooled = jnp.concatenate(
        [jnp.sum(hidden[b * S:(b + 1) * S, :], axis=0, keepdims=True)
         for b in range(B)],
        axis=0) * INV_S                                        # (B, D)
    logits = jnp.dot(pooled, w_head,
                     preferred_element_type=jnp.float32) + b_head   # (B, NC)
    logits_ref[...] = logits

    # --- CatLoss: softmax cross-entropy, mean over batch ---------------------
    m = jnp.max(logits, axis=-1, keepdims=True)
    z = logits - m
    lse = jnp.log(jnp.sum(jnp.exp(z), axis=-1, keepdims=True))        # (B, 1)

    # single vector compare against the (B, 1) target column (no Python loop)
    # TODO(synk): targets outside [0, NUM_CLASSES) silently contribute 0 loss.
    class_iota = jax.lax.broadcasted_iota(jnp.int32, (B, NUM_CLASSES), 1)
    onehot = (class_iota == tgt_ref[...]).astype(jnp.float32)         # (B, NC)

    nll = jnp.sum(onehot * (lse - z), axis=-1, keepdims=True)         # (B, 1)
    loss_ref[...] = jnp.sum(nll, axis=0, keepdims=True) * INV_B       # (1, 1)


def pack_params(params):
    """Build the single (SLAB_ROWS, D) parameter slab ONCE, outside the
    per-step forward path (hoisted per perf review)."""
    vec = jnp.zeros((VEC_ROWS, D), jnp.float32)
    vec = vec.at[ROW_B_EMB].set(params["b_emb"][0])
    vec = vec.at[ROW_GAMMA].set(params["gamma"][0])
    vec = vec.at[ROW_BETA].set(params["beta"][0])
    vec = vec.at[ROW_B_HEAD, :NUM_CLASSES].set(params["b_head"][0])
    w_head_pad = jnp.zeros((D, D), jnp.float32).at[:, :NUM_CLASSES].set(
        params["w_head"])
    return jnp.concatenate([vec, params["w_emb"], w_head_pad], axis=0)  # (88, D)


def hf_img_tune_forward(x, targets, slab):
    """x: (B, C, H, W) f32 NCHW; targets: (B,) int labels; slab: packed params."""
    b, c, h, w = x.shape
    assert (b, c, h, w) == (B, C, H, W)
    assert slab.shape == (SLAB_ROWS, D)

    # glue: patchify NCHW -> (B*S, C*P*P) rows of flattened patches.
    # allow_input_fusion on this operand lets XLA fuse the transpose into the
    # pallas custom call rather than launching it as a standalone kernel.
    xp = x.reshape(B, C, H // PATCH, PATCH, W // PATCH, PATCH)
    xp = xp.transpose(0, 2, 4, 1, 3, 5).reshape(B * S, PDIM)

    tgt = targets.astype(jnp.int32).reshape(B, 1)

    vmem = pl.BlockSpec(memory_space=pltpu.MemorySpace.VMEM)

    cost = pl.CostEstimate(
        flops=2 * (B * S) * PDIM * D + 2 * B * D * NUM_CLASSES + 12 * (B * S) * D,
        transcendentals=(B * S) * (D + 1) + B * (NUM_CLASSES + 1),
        bytes_accessed=4 * ((B * S) * PDIM + SLAB_ROWS * D
                            + B + B * NUM_CLASSES + 1))

    logits, loss = pl.pallas_call(
        img_tune_kernel,
        out_shape=(jax.ShapeDtypeStruct((B, NUM_CLASSES), jnp.float32),
                   jax.ShapeDtypeStruct((1, 1), jnp.float32)),
        in_specs=[vmem, vmem, vmem],          # 3 input DMAs: targets, patches, slab
        out_specs=(vmem, vmem),
        compiler_params=pltpu.CompilerParams(
            allow_input_fusion=[False, True, False]),
        cost_estimate=cost,
    )(tgt, xp, slab)
    return logits, loss[0, 0]


def init_params(key):
    k1, k2 = jax.random.split(key, 2)
    return {
        "w_emb": jax.random.normal(k1, (PDIM, D), jnp.float32) * 0.02,
        "b_emb": jnp.zeros((1, D), jnp.float32),
        "gamma": jnp.ones((1, D), jnp.float32),
        "beta": jnp.zeros((1, D), jnp.float32),
        "w_head": jax.random.normal(k2, (D, NUM_CLASSES), jnp.float32) * 0.02,
        "b_head": jnp.zeros((1, NUM_CLASSES), jnp.float32),
    }


if __name__ == "__main__":
    key = jax.random.PRNGKey(0)
    kx, kt, kp = jax.random.split(key, 3)
    x = jax.random.uniform(kx, (B, C, H, W), jnp.float32)          # image batch, NCHW
    targets = jax.random.randint(kt, (B,), 0, NUM_CLASSES, jnp.int32)
    params = init_params(kp)
    slab = pack_params(params)            # built once; NOT in the per-call path

    fwd = jax.jit(hf_img_tune_forward)
    logits, loss = fwd(x, targets, slab)
    jax.block_until_ready((logits, loss))
    assert logits.shape == (B, NUM_CLASSES)
    assert loss.shape == ()
    # TODO(synk): the real HF backbone (full pretrained ViT encoder stack +
    # AutoImageProcessor) is replaced by a single patch-embed + LayerNorm block;
    # no checkpoint is loaded by design.
    print("KERNEL_OK")
</pallas_src>

<mosaic_0001>
module attributes {stable_mosaic.version = 11 : i64} {
  func.func @img_tune_kernel(%arg0: memref<2x1xi32, #tpu.memory_space<vmem>>, %arg1: memref<32x48xf32, #tpu.memory_space<vmem>>, %arg2: memref<88x32xf32, #tpu.memory_space<vmem>>, %arg3: memref<2x10xf32, #tpu.memory_space<vmem>>, %arg4: memref<1x1xf32, #tpu.memory_space<vmem>>) attributes {dimension_semantics = [], scalar_prefetch = 0 : i64, scratch_operands = 0 : i64, tpu.core_type = #tpu.core_type<tc>} {
    %c0 = arith.constant 0 : index
    %c0_0 = arith.constant 0 : index
    %0 = vector.load %arg1[%c0, %c0_0] : memref<32x48xf32, #tpu.memory_space<vmem>>, vector<32x48xf32>
    %cst = arith.constant 5.000000e-01 : f32
    %1 = vector.broadcast %cst : f32 to vector<32x48xf32>
    %2 = arith.subf %0, %1 : vector<32x48xf32>
    %cst_1 = arith.constant 4.000000e+00 : f32
    %3 = vector.broadcast %cst_1 : f32 to vector<32x48xf32>
    %4 = arith.mulf %2, %3 : vector<32x48xf32>
    %c0_2 = arith.constant 0 : index
    %c0_3 = arith.constant 0 : index
    %5 = vector.load %arg2[%c0_2, %c0_3] : memref<88x32xf32, #tpu.memory_space<vmem>>, vector<1x32xf32>
    %c1 = arith.constant 1 : index
    %c0_4 = arith.constant 0 : index
    %6 = vector.load %arg2[%c1, %c0_4] : memref<88x32xf32, #tpu.memory_space<vmem>>, vector<1x32xf32>
    %c2 = arith.constant 2 : index
    %c0_5 = arith.constant 0 : index
    %7 = vector.load %arg2[%c2, %c0_5] : memref<88x32xf32, #tpu.memory_space<vmem>>, vector<1x32xf32>
    %c3 = arith.constant 3 : index
    %c0_6 = arith.constant 0 : index
    %8 = vector.load %arg2[%c3, %c0_6] : memref<88x32xf32, #tpu.memory_space<vmem>>, vector<1x10xf32>
    %c8 = arith.constant 8 : index
    %c0_7 = arith.constant 0 : index
    %9 = vector.load %arg2[%c8, %c0_7] : memref<88x32xf32, #tpu.memory_space<vmem>>, vector<48x32xf32>
    %c56 = arith.constant 56 : index
    %c0_8 = arith.constant 0 : index
    %10 = vector.load %arg2[%c56, %c0_8] : memref<88x32xf32, #tpu.memory_space<vmem>>, vector<32x10xf32>
    %cst_9 = arith.constant dense<0.000000e+00> : vector<32x32xf32>
    %11 = tpu.matmul %4, %9, %cst_9 {dimension_numbers = #tpu.dot_dimension_numbers<[1], [0], [0], [1], [0, 0, 1, 1], [], []>} : vector<32x48xf32>, vector<48x32xf32>, vector<32x32xf32> -> vector<32x32xf32>
    %12 = vector.broadcast %5 : vector<1x32xf32> to vector<32x32xf32>
    %13 = arith.addf %11, %12 : vector<32x32xf32>
    %14 = arith.mulf %13, %13 : vector<32x32xf32>
    %15 = arith.mulf %13, %14 : vector<32x32xf32>
    %cst_10 = arith.constant 4.471500e-02 : f32
    %16 = vector.broadcast %cst_10 : f32 to vector<32x32xf32>
    %17 = arith.mulf %16, %15 : vector<32x32xf32>
    %18 = arith.addf %13, %17 : vector<32x32xf32>
    %cst_11 = arith.constant 0.797884583 : f32
    %19 = vector.broadcast %cst_11 : f32 to vector<32x32xf32>
    %20 = arith.mulf %19, %18 : vector<32x32xf32>
    %21 = math.tanh %20 : vector<32x32xf32>
    %cst_12 = arith.constant 1.000000e+00 : f32
    %22 = vector.broadcast %cst_12 : f32 to vector<32x32xf32>
    %23 = arith.addf %22, %21 : vector<32x32xf32>
    %cst_13 = arith.constant 5.000000e-01 : f32
    %24 = vector.broadcast %cst_13 : f32 to vector<32x32xf32>
    %25 = arith.mulf %24, %23 : vector<32x32xf32>
    %26 = arith.mulf %13, %25 : vector<32x32xf32>
    %cst_14 = arith.constant dense<0.000000e+00> : vector<32xf32>
    %27 = vector.multi_reduction <add>, %26, %cst_14 [1] : vector<32x32xf32> to vector<32xf32>
    %28 = vector.shape_cast %27 : vector<32xf32> to vector<32x1xf32>
    %cst_15 = arith.constant 3.200000e+01 : f32
    %29 = vector.broadcast %cst_15 : f32 to vector<32x1xf32>
    %30 = arith.divf %28, %29 : vector<32x1xf32>
    %31 = vector.broadcast %30 : vector<32x1xf32> to vector<32x32xf32>
    %32 = arith.subf %26, %31 : vector<32x32xf32>
    %33 = vector.broadcast %30 : vector<32x1xf32> to vector<32x32xf32>
    %34 = arith.subf %26, %33 : vector<32x32xf32>
    %35 = arith.mulf %32, %34 : vector<32x32xf32>
    %cst_16 = arith.constant dense<0.000000e+00> : vector<32xf32>
    %36 = vector.multi_reduction <add>, %35, %cst_16 [1] : vector<32x32xf32> to vector<32xf32>
    %37 = vector.shape_cast %36 : vector<32xf32> to vector<32x1xf32>
    %cst_17 = arith.constant 3.200000e+01 : f32
    %38 = vector.broadcast %cst_17 : f32 to vector<32x1xf32>
    %39 = arith.divf %37, %38 : vector<32x1xf32>
    %40 = vector.broadcast %30 : vector<32x1xf32> to vector<32x32xf32>
    %41 = arith.subf %26, %40 : vector<32x32xf32>
    %cst_18 = arith.constant 9.99999997E-7 : f32
    %42 = vector.broadcast %cst_18 : f32 to vector<32x1xf32>
    %43 = arith.addf %39, %42 : vector<32x1xf32>
    %44 = math.rsqrt %43 : vector<32x1xf32>
    %45 = vector.broadcast %44 : vector<32x1xf32> to vector<32x32xf32>
    %46 = arith.mulf %41, %45 : vector<32x32xf32>
    %47 = vector.broadcast %6 : vector<1x32xf32> to vector<32x32xf32>
    %48 = arith.mulf %46, %47 : vector<32x32xf32>
    %49 = vector.broadcast %7 : vector<1x32xf32> to vector<32x32xf32>
    %50 = arith.addf %48, %49 : vector<32x32xf32>
    %51 = vector.extract_strided_slice %50 {offsets = [0, 0], sizes = [16, 32], strides = [1, 1]} : vector<32x32xf32> to vector<16x32xf32>
    %cst_19 = arith.constant dense<0.000000e+00> : vector<32xf32>
    %52 = vector.multi_reduction <add>, %51, %cst_19 [0] : vector<16x32xf32> to vector<32xf32>
    %53 = vector.shape_cast %52 : vector<32xf32> to vector<1x32xf32>
    %54 = vector.extract_strided_slice %50 {offsets = [16, 0], sizes = [16, 32], strides = [1, 1]} : vector<32x32xf32> to vector<16x32xf32>
    %cst_20 = arith.constant dense<0.000000e+00> : vector<32xf32>
    %55 = vector.multi_reduction <add>, %54, %cst_20 [0] : vector<16x32xf32> to vector<32xf32>
    %56 = vector.shape_cast %55 : vector<32xf32> to vector<1x32xf32>
    %57 = tpu.concatenate %53, %56 in 0 : vector<1x32xf32>, vector<1x32xf32> -> vector<2x32xf32>
    %cst_21 = arith.constant 6.250000e-02 : f32
    %58 = vector.broadcast %cst_21 : f32 to vector<2x32xf32>
    %59 = arith.mulf %57, %58 : vector<2x32xf32>
    %cst_22 = arith.constant dense<0.000000e+00> : vector<2x10xf32>
    %60 = tpu.matmul %59, %10, %cst_22 {dimension_numbers = #tpu.dot_dimension_numbers<[1], [0], [0], [1], [0, 0, 1, 1], [], []>} : vector<2x32xf32>, vector<32x10xf32>, vector<2x10xf32> -> vector<2x10xf32>
    %61 = vector.broadcast %8 : vector<1x10xf32> to vector<2x10xf32>
    %62 = arith.addf %60, %61 : vector<2x10xf32>
    %c0_23 = arith.constant 0 : index
    %c0_24 = arith.constant 0 : index
    %63 = vector.load %arg3[%c0_23, %c0_24] : memref<2x10xf32, #tpu.memory_space<vmem>>, vector<2x10xf32>
    tpu.vector_store %arg3[%c0_23, %c0_24], %62 {strides = array<i32>} : memref<2x10xf32, #tpu.memory_space<vmem>>, vector<2x10xf32>,
    %cst_25 = arith.constant dense<0xFF800000> : vector<2xf32>
    %64 = vector.multi_reduction <maximumf>, %62, %cst_25 [1] : vector<2x10xf32> to vector<2xf32>
    %65 = vector.shape_cast %64 : vector<2xf32> to vector<2x1xf32>
    %66 = vector.broadcast %65 : vector<2x1xf32> to vector<2x10xf32>
    %67 = arith.subf %62, %66 : vector<2x10xf32>
    %68 = math.exp %67 : vector<2x10xf32>
    %cst_26 = arith.constant dense<0.000000e+00> : vector<2xf32>
    %69 = vector.multi_reduction <add>, %68, %cst_26 [1] : vector<2x10xf32> to vector<2xf32>
    %70 = vector.shape_cast %69 : vector<2xf32> to vector<2x1xf32>
    %71 = math.log %70 : vector<2x1xf32>
    %72 = tpu.iota {dimensions = array<i32: 1>} : vector<2x10xi32>
    %c0_27 = arith.constant 0 : index
    %c0_28 = arith.constant 0 : index
    %73 = vector.load %arg0[%c0_27, %c0_28] : memref<2x1xi32, #tpu.memory_space<vmem>>, vector<2x1xi32>
    %74 = vector.broadcast %73 : vector<2x1xi32> to vector<2x10xi32>
    %75 = arith.cmpi eq, %72, %74 : vector<2x10xi32>
    %76 = arith.extui %75 : vector<2x10xi1> to vector<2x10xi32>
    %77 = arith.sitofp %76 : vector<2x10xi32> to vector<2x10xf32>
    %78 = vector.broadcast %71 : vector<2x1xf32> to vector<2x10xf32>
    %79 = arith.subf %78, %67 : vector<2x10xf32>
    %80 = arith.mulf %77, %79 : vector<2x10xf32>
    %cst_29 = arith.constant dense<0.000000e+00> : vector<2xf32>
    %81 = vector.multi_reduction <add>, %80, %cst_29 [1] : vector<2x10xf32> to vector<2xf32>
    %82 = vector.shape_cast %81 : vector<2xf32> to vector<2x1xf32>
    %cst_30 = arith.constant dense<0.000000e+00> : vector<1xf32>
    %83 = vector.multi_reduction <add>, %82, %cst_30 [0] : vector<2x1xf32> to vector<1xf32>
    %84 = vector.shape_cast %83 : vector<1xf32> to vector<1x1xf32>
    %cst_31 = arith.constant 5.000000e-01 : f32
    %85 = vector.broadcast %cst_31 : f32 to vector<1x1xf32>
    %86 = arith.mulf %84, %85 : vector<1x1xf32>
    %c0_32 = arith.constant 0 : index
    %c0_33 = arith.constant 0 : index
    %87 = vector.load %arg4[%c0_32, %c0_33] : memref<1x1xf32, #tpu.memory_space<vmem>>, vector<1x1xf32>
    tpu.vector_store %arg4[%c0_32, %c0_33], %86 {strides = array<i32>} : memref<1x1xf32, #tpu.memory_space<vmem>>, vector<1x1xf32>,
    return
  }
}

</mosaic_0001>

<bundles_post_ra>
// kernel: hf_img_tune_forward.1
= control target key start
LH: loop header
LB: loop body
LE: loop exit
PB: predicated region body
PF: predicated region fallthrough
CT: control target
= control target key end

     0   :  { %10 = vsyncpa [#allocation3], 0  ;;  %s581_s0 = inlined_call_operand.vmem [shape: s32[2,1], index: 0, kind: input, shape index: {}]   ;;  %s582_s1 = inlined_call_operand.vmem [shape: f32[32,48], index: 1, kind: input, shape index: {}]   ;;  %s583_s2 = inlined_call_operand.vmem [shape: f32[88,32], index: 2, kind: input, shape index: {}]   ;;  %s584_s3 = inlined_call_operand.hbm [shape: f32[2,10], index: 3, kind: output, shape index: {0}]   ;;  %s585_s4 = inlined_call_operand.hbm [shape: f32[1,1], index: 4, kind: output, shape index: {1}]  }
   0x1   :  { %v39_v0 = vld [vmem:[%s583_s2 + $0x30] sm:$0xff]  ;;  %v38_v1 = vld [vmem:[%s583_s2 + $0x28] sm:$0xff]  ;;  %v37_v2 = vld [vmem:[%s583_s2 + $0x20] sm:$0xff] }
   0x2   :  { %68 = vmatpush.msra.mxu0 %v39_v0  ;;  %354 = vmatpush.msra.mxu2 %v39_v0  ;;  %v18_v3 = vld [vmem:[%s582_s1] sm:$0xff]  ;;  %v19_v4 = vld [vmem:[%s582_s1 + $0x8] sm:$0xff]  ;;  %v20_v5 = vld [vmem:[%s582_s1 + $0x10] sm:$0xff] }
   0x3   :  { %355 = vmatpush.msra.mxu3 %v39_v0  ;;  %v36_v6 = vld [vmem:[%s583_s2 + $0x18] sm:$0xff]  ;;  %v344_v7 = vadd.f32 -0.5, %v18_v3  ;;  %v345_v8 = vadd.f32 -0.5, %v19_v4  ;;  %v346_v9 = vadd.f32 -0.5, %v20_v5  ;;  %v35_v10 = vld [vmem:[%s583_s2 + $0x10] sm:$0xff] }
   0x4   :  { %69 = vmatpush.msra.mxu0 %v38_v1  ;;  %356 = vmatpush.msra.mxu2 %v38_v1 }
   0x5   :  { %357 = vmatpush.msra.mxu3 %v38_v1 }
   0x6   :  { %70 = vmatpush.msra.mxu0 %v37_v2  ;;  %358 = vmatpush.msra.mxu2 %v37_v2 }
   0x7   :  { %359 = vmatpush.msra.mxu3 %v37_v2 }
   0x8   :  { %11 = vsyncpa [#allocation5], 0  ;;  %71 = vmatpush.msra.mxu0 %v36_v6  ;;  %360 = vmatpush.msra.mxu2 %v36_v6  ;;  %v34_v11 = vld [vmem:[%s583_s2 + $0x8] sm:$0xff]  ;;  %v26_v12 = vmul.f32 4.0, %v344_v7  ;;  %vm45_vm0 = vcmask 392192   ;;  %v27_v13 = vmul.f32 4.0, %v345_v8 }
   0x9   :  { %361 = vmatpush.msra.mxu3 %v36_v6  ;;  %v28_v14 = vmul.f32 4.0, %v346_v9  ;;  %v21_v15 = vld [vmem:[%s582_s1 + $0x18] sm:$0xff]  ;;  %v373_v18 = vld [vmem:[%s583_s2] ss:$0 sm:$0xff]  ;;  %vm123_vm1 = vcmask 261120   ;;  %v451_v3 = vmov 32.0  }
   0xa   :  { %72 = vmatpush.msra.mxu0 %v35_v10  ;;  %362 = vmatpush.msra.mxu2 %v35_v10  ;;  %v347_v16 = vadd.f32 -0.5, %v21_v15  ;;  %vm247_vm15 = vcmask 1040384   ;;  %s319_s26 = sshll.u32 %s584_s3, 4  ;;  %s454_s27 = smov [#allocation2]   ;;  %s320_s26 = int_to_ptr.hbm [resolvable:$true] %s319_s26 }
   0xb   :  { %363 = vmatpush.msra.mxu3 %v35_v10  ;;  %s317_s28 = sshll.u32 %s454_s27, 4  ;;  %s455_s29 = smov [#allocation4]   ;;  %s318_s28 = int_to_ptr.vmem [resolvable:$true] %s317_s28 }
   0xc   :  { %73 = vmatpush.msra.mxu0 %v34_v11  ;;  %364 = vmatpush.msra.mxu2 %v34_v11  ;;  %v29_v17 = vmul.f32 4.0, %v347_v16  ;;  %s328_s30 = sshll.u32 %s455_s29, 4  ;;  %s330_s3 = sshll.u32 %s585_s4, 4  ;;  %s329_s30 = int_to_ptr.vmem [resolvable:$true] %s328_s30  ;;  %s331_s3 = int_to_ptr.hbm [resolvable:$true] %s330_s3 }
   0xd   :  { %365 = vmatpush.msra.mxu3 %v34_v11  ;;  %348 = vmatmul.msk.f32.vlgmr.msra.gmra.mxu0 %vm45_vm0, %v26_v12 }
   0xe   :  { %349 = vmatmul.msk.f32.vlgmr.msra.gmra.mxu2 %vm45_vm0, %v27_v13  ;;  %350 = vmatmul.msk.f32.vlgmr.msra.gmra.mxu3 %vm45_vm0, %v28_v14 }
  0x16   :  { %351 = vmatmul.msk.f32.gmra.mxu3 %vm45_vm0, %v29_v17  ;;  %vm274_vm0 = vcmask 74752  }
  0x8a   :  { %v75_v19 = vpop.f32.mrf.mxu0 }
  0x8b   :  { %v76_v20 = vadd.f32 %v373_v18, %v75_v19 }
  0x8d   :  { %v87_v21 = vmul.f32 %v76_v20, %v76_v20 }
  0x8f   :  { %v91_v22 = vmul.f32 %v87_v21, %v76_v20 }
  0x91   :  { %v78_v23 = vpop.f32.mrf.mxu2  ;;  %v81_v24 = vpop.f32.mrf.mxu3  ;;  %v95_v25 = vmul.f32 0.044715, %v91_v22 }
  0x92   :  { %v79_v26 = vadd.f32 %v373_v18, %v78_v23  ;;  %v82_v27 = vadd.f32 %v373_v18, %v81_v24 }
  0x93   :  { %v99_v28 = vadd.f32 %v95_v25, %v76_v20 }
  0x94   :  { %v88_v29 = vmul.f32 %v79_v26, %v79_v26  ;;  %v89_v30 = vmul.f32 %v82_v27, %v82_v27 }
  0x95   :  { %v103_v31 = vmul.f32 0.7978846, %v99_v28 }
  0x96   :  { %v92_v32 = vmul.f32 %v88_v29, %v79_v26  ;;  %v93_v33 = vmul.f32 %v89_v30, %v82_v27 }
  0x97   :  { %377 = vtanh.f32 %v103_v31 }
  0x98   :  { %v96_v34 = vmul.f32 0.044715, %v92_v32  ;;  %v97_v35 = vmul.f32 0.044715, %v93_v33 }
  0x99   :  { %v84_v36 = vpop.f32.mrf.mxu3 }
  0x9a   :  { %v85_v37 = vadd.f32 %v373_v18, %v84_v36  ;;  %v101_v38 = vadd.f32 %v97_v35, %v82_v27  ;;  %v100_v39 = vadd.f32 %v96_v34, %v79_v26 }
  0x9c   :  { %v90_v40 = vmul.f32 %v85_v37, %v85_v37  ;;  %v105_v41 = vmul.f32 0.7978846, %v101_v38  ;;  %v104_v42 = vmul.f32 0.7978846, %v100_v39  ;;  %v43_v38 = vld [vmem:[%s583_s2 + $0x50] sm:$0xff]  ;;  %v42_v39 = vld [vmem:[%s583_s2 + $0x48] sm:$0xff] }
  0x9d   :  { %v378_v43 = vpop.eup %377  ;;  %266 = vmatpush.msra.mxu1 %v43_v38 }
  0x9e   :  { %v94_v44 = vmul.f32 %v90_v40, %v85_v37  ;;  %v111_v45 = vadd.f32 1.0, %v378_v43  ;;  %379 = vtanh.f32 %v105_v41  ;;  %v41_v43 = vld [vmem:[%s583_s2 + $0x40] sm:$0xff] }
  0x9f   :  { %381 = vtanh.f32 %v104_v42  ;;  %267 = vmatpush.msra.mxu1 %v42_v39 }
  0xa0   :  { %v98_v46 = vmul.f32 0.044715, %v94_v44  ;;  %v115_v47 = vmul.f32 0.5, %v111_v45  ;;  %v40_v45 = vld [vmem:[%s583_s2 + $0x38] sm:$0xff] }
  0xa1   :  { %268 = vmatpush.msra.mxu1 %v41_v43 }
  0xa2   :  { %v119_v48 = vmul.f32 %v115_v47, %v76_v20  ;;  %v102_v49 = vadd.f32 %v98_v46, %v85_v37 }
  0xa3   :  { %269 = vmatpush.msra.mxu1 %v40_v45 }
  0xa4   :  { %v380_v50 = vpop.eup %379  ;;  %v124_v51 = vsel %vm123_vm1, %v119_v48, 0.0  ;;  %v106_v52 = vmul.f32 0.7978846, %v102_v49 }
  0xa5   :  { %v382_v53 = vpop.eup %381  ;;  %125 = vadd.xlane.f32.xlu0 %v124_v51  ;;  %v113_v54 = vadd.f32 1.0, %v380_v50 }
  0xa6   :  { %v112_v55 = vadd.f32 1.0, %v382_v53  ;;  %383 = vtanh.f32 %v106_v52 }
  0xa7   :  { %v117_v56 = vmul.f32 0.5, %v113_v54  ;;  %385 = vrcp.f32 %v451_v3 }
  0xa8   :  { %v116_v57 = vmul.f32 0.5, %v112_v55 }
  0xa9   :  { %v121_v58 = vmul.f32 %v117_v56, %v82_v27 }
  0xaa   :  { %v120_v59 = vmul.f32 %v116_v57, %v79_v26 }
  0xab   :  { %v130_v60 = vsel %vm123_vm1, %v121_v58, 0.0 }
  0xac   :  { %v384_v61 = vpop.eup %383  ;;  %131 = vadd.xlane.f32.xlu1 %v130_v60  ;;  %v127_v62 = vsel %vm123_vm1, %v120_v59, 0.0 }
  0xad   :  { %128 = vadd.xlane.f32.xlu0 %v127_v62  ;;  %v114_v63 = vadd.f32 1.0, %v384_v61  ;;  %v386_v4 = vpop.eup %385  ;;  %v374_v61 = vld [vmem:[%s583_s2 + $0x1] ss:$0 sm:$0xff] }
  0xae   :  { %v137_v5 = vmul.f32 32.0, %v386_v4  ;;  %vm141_vm2 = vweird.f32 %v386_v4 }
  0xaf   :  { %v118_v0 = vmul.f32 0.5, %v114_v63 }
  0xb0   :  { %v138_v6 = vsub.f32 1.0, %v137_v5  ;;  %v375_v5 = vld [vmem:[%s583_s2 + $0x2] ss:$0 sm:$0xff] }
  0xb1   :  { %v122_v1 = vmul.f32 %v118_v0, %v85_v37 }
  0xb2   :  { %v139_v7 = vmul.f32 %v386_v4, %v138_v6 }
  0xb3   :  { %v133_v2 = vsel %vm123_vm1, %v122_v1, 0.0 }
  0xb4   :  { %134 = vadd.xlane.f32.xlu1 %v133_v2  ;;  %v140_v8 = vadd.f32 %v386_v4, %v139_v7 }
  0xb6   :  { %v142_v9 = vsel %vm141_vm2, %v386_v4, %v140_v8  ;;  %vm301_vm2 = vcmask 1041408  }
 0x118   :  { %v126_v10 = vpop.xlane.xlu0 %125 }
 0x119   :  { %v143_v11 = vmul.f32 %v142_v9, %v126_v10 }
 0x11b   :  { %v518_v12 = vsub.f32 %v119_v48, %v143_v11 }
 0x11d   :  { %v151_v13 = vmul.f32 %v518_v12, %v518_v12 }
 0x11f   :  { %v132_v14 = vpop.xlane.xlu1 %131  ;;  %v155_v15 = vsel %vm123_vm1, %v151_v13, 0.0 }
 0x120   :  { %v145_v16 = vmul.f32 %v142_v9, %v132_v14  ;;  %156 = vadd.xlane.f32.xlu2 %v155_v15  ;;  %v129_v17 = vpop.xlane.xlu0 %128 }
 0x121   :  { %v144_v18 = vmul.f32 %v142_v9, %v129_v17 }
 0x122   :  { %v523_v19 = vsub.f32 %v121_v58, %v145_v16 }
 0x123   :  { %v525_v20 = vsub.f32 %v120_v59, %v144_v18 }
 0x124   :  { %v153_v21 = vmul.f32 %v523_v19, %v523_v19 }
 0x125   :  { %v152_v22 = vmul.f32 %v525_v20, %v525_v20 }
 0x126   :  { %v161_v23 = vsel %vm123_vm1, %v153_v21, 0.0 }
 0x127   :  { %v135_v24 = vpop.xlane.xlu1 %134  ;;  %162 = vadd.xlane.f32.xlu0 %v161_v23  ;;  %v158_v25 = vsel %vm123_vm1, %v152_v22, 0.0 }
 0x128   :  { %v146_v26 = vmul.f32 %v142_v9, %v135_v24  ;;  %159 = vadd.xlane.f32.xlu2 %v158_v25 }
 0x12a   :  { %v533_v27 = vsub.f32 %v122_v1, %v146_v26 }
 0x12c   :  { %v154_v28 = vmul.f32 %v533_v27, %v533_v27 }
 0x12e   :  { %v164_v29 = vsel %vm123_vm1, %v154_v28, 0.0 }
 0x12f   :  { %165 = vadd.xlane.f32.xlu1 %v164_v29 }
 0x193   :  { %v157_v30 = vpop.xlane.xlu2 %156 }
 0x194   :  { %v167_v31 = vmul.f32 %v157_v30, %v142_v9 }
 0x196   :  { %v171_v32 = vadd.f32 1e-06, %v167_v31 }
 0x198   :  { %387 = vrsqrt.f32 %v171_v32  ;;  %vm181_vm4 = vweird.f32 %v171_v32 }
 0x19a   :  { %v163_v33 = vpop.xlane.xlu0 %162 }
 0x19b   :  { %v169_v34 = vmul.f32 %v163_v33, %v142_v9  ;;  %v160_v35 = vpop.xlane.xlu2 %159 }
 0x19c   :  { %v168_v36 = vmul.f32 %v160_v35, %v142_v9 }
 0x19d   :  { %v173_v37 = vadd.f32 1e-06, %v169_v34 }
 0x19e   :  { %v388_v40 = vpop.eup %387  ;;  %v172_v41 = vadd.f32 1e-06, %v168_v36 }
 0x19f   :  { %v176_v42 = vmul.f32 %v388_v40, %v171_v32  ;;  %389 = vrsqrt.f32 %v173_v37  ;;  %vm182_vm3 = vweird.f32 %v388_v40  ;;  %vm201_vm8 = vweird.f32 %v173_v37 }
 0x1a0   :  { %391 = vrsqrt.f32 %v172_v41  ;;  %vm183_vm5 = vmor %vm181_vm4, %vm182_vm3  ;;  %vm191_vm10 = vweird.f32 %v172_v41  ;;  %vm310_vm3 = vcmask 0  }
 0x1a1   :  { %v177_v44 = vmul.f32 %v388_v40, %v176_v42 }
 0x1a2   :  { %v166_v46 = vpop.xlane.xlu1 %165 }
 0x1a3   :  { %v178_v47 = vmul.f32 0.5, %v177_v44  ;;  %v170_v48 = vmul.f32 %v166_v46, %v142_v9  ;;  %v376_v44 = vld [vmem:[%s583_s2 + $0x3] ss:$0 sm:$0xff] }
 0x1a5   :  { %v390_v49 = vpop.eup %389  ;;  %v179_v50 = vsub.f32 1.5, %v178_v47  ;;  %v174_v51 = vadd.f32 1e-06, %v170_v48  ;;  %v289_v48 = vld [vmem:[%s581_s0] sm:$0x3] }
 0x1a6   :  { %v392_v52 = vpop.eup %391  ;;  %v196_v53 = vmul.f32 %v390_v49, %v173_v37  ;;  %vm202_vm6 = vweird.f32 %v390_v49 }
 0x1a7   :  { %v180_v54 = vmul.f32 %v388_v40, %v179_v50  ;;  %v186_v55 = vmul.f32 %v392_v52, %v172_v41  ;;  %393 = vrsqrt.f32 %v174_v51  ;;  %vm192_vm7 = vweird.f32 %v392_v52  ;;  %vm203_vm9 = vmor %vm201_vm8, %vm202_vm6 }
 0x1a8   :  { %v197_v56 = vmul.f32 %v390_v49, %v196_v53  ;;  %vm193_vm11 = vmor %vm191_vm10, %vm192_vm7  ;;  %vm211_vm13 = vweird.f32 %v174_v51 }
 0x1a9   :  { %v184_v57 = vsel %vm183_vm5, %v388_v40, %v180_v54  ;;  %v187_v58 = vmul.f32 %v392_v52, %v186_v55  ;;  %v287_v55 = vlaneseq }
 0x1aa   :  { %v198_v59 = vmul.f32 0.5, %v197_v56  ;;  %v215_v62 = vmul.f32 %v184_v57, %v518_v12 }
 0x1ab   :  { %v188_v60 = vmul.f32 0.5, %v187_v58  ;;  %v288_v57 = vand.u32 127, %v287_v55 }
 0x1ac   :  { %v199_v63 = vsub.f32 1.5, %v198_v59  ;;  %v220_v6 = vmul.f32 %v374_v61, %v215_v62 }
 0x1ad   :  { %v394_v0 = vpop.eup %393  ;;  %v189_v1 = vsub.f32 1.5, %v188_v60 }
 0x1ae   :  { %v200_v2 = vmul.f32 %v390_v49, %v199_v63  ;;  %v206_v3 = vmul.f32 %v394_v0, %v174_v51  ;;  %v225_v13 = vadd.f32 %v375_v5, %v220_v6  ;;  %vm212_vm12 = vweird.f32 %v394_v0 }
 0x1af   :  { %v190_v4 = vmul.f32 %v392_v52, %v189_v1  ;;  %vm213_vm14 = vmor %vm211_vm13, %vm212_vm12 }
 0x1b0   :  { %v204_v7 = vsel %vm203_vm9, %v390_v49, %v200_v2  ;;  %v207_v8 = vmul.f32 %v394_v0, %v206_v3  ;;  %v229_v22 = vsel %vm123_vm1, %v225_v13, 0.0  ;;  %v452_v49 = vmov 0  }
 0x1b1   :  { %v194_v9 = vsel %vm193_vm11, %v392_v52, %v190_v4  ;;  %v217_v12 = vmul.f32 %v204_v7, %v523_v19  ;;  %371 = vset.pattern.permute.xlu1 %v452_v49  ;;  %372 = vset.pattern.permute.xlu0 %v452_v49 }
 0x1b2   :  { %v216_v10 = vmul.f32 %v194_v9, %v525_v20  ;;  %v208_v11 = vmul.f32 0.5, %v207_v8  ;;  %291 = vperm.xlu1 %371, %v289_v48  }
 0x1b3   :  { %v222_v18 = vmul.f32 %v374_v61, %v217_v12 }
 0x1b4   :  { %v221_v14 = vmul.f32 %v374_v61, %v216_v10  ;;  %v209_v15 = vsub.f32 1.5, %v208_v11 }
 0x1b5   :  { %v227_v25 = vadd.f32 %v375_v5, %v222_v18 }
 0x1b6   :  { %v226_v16 = vadd.f32 %v375_v5, %v221_v14  ;;  %v210_v17 = vmul.f32 %v394_v0, %v209_v15 }
 0x1b7   :  { %v238_v30 = vsel %vm123_vm1, %v227_v25, 0.0 }
 0x1b8   :  { %v214_v21 = vsel %vm213_vm14, %v394_v0, %v210_v17  ;;  %v230_v23 = vsel %vm123_vm1, %v226_v16, 0.0 }
 0x1b9   :  { %v218_v24 = vmul.f32 %v214_v21, %v533_v27  ;;  %v231_v20 = vadd.f32 %v230_v23, %v229_v22 }
 0x1bb   :  { %v223_v26 = vmul.f32 %v374_v61, %v218_v24  ;;  %v232_v19 = vrot.slane %v231_v20, 4  ;;  %v453_v61 = vmov 0.0  }
 0x1bd   :  { %v228_v28 = vadd.f32 %v375_v5, %v223_v26  ;;  %v233_v29 = vadd.f32 %v232_v19, %v231_v20 }
 0x1bf   :  { %v239_v31 = vsel %vm123_vm1, %v228_v28, 0.0  ;;  %v234_v32 = vrot.slane %v233_v29, 2 }
 0x1c0   :  { %v240_v33 = vadd.f32 %v239_v31, %v238_v30 }
 0x1c1   :  { %v235_v35 = vadd.f32 %v234_v32, %v233_v29 }
 0x1c2   :  { %v241_v34 = vrot.slane %v240_v33, 4 }
 0x1c3   :  { %v236_v38 = vrot.slane %v235_v35, 1 }
 0x1c4   :  { %v242_v36 = vadd.f32 %v241_v34, %v240_v33 }
 0x1c5   :  { %v237_v27 = vadd.f32 %v236_v38, %v235_v35 }
 0x1c6   :  { %v243_v37 = vrot.slane %v242_v36, 2 }
 0x1c8   :  { %v244_v39 = vadd.f32 %v243_v37, %v242_v36 }
 0x1ca   :  { %v245_v40 = vrot.slane %v244_v39, 1 }
 0x1cc   :  { %v246_v41 = vadd.f32 %v245_v40, %v244_v39 }
 0x1ce   :  { %v248_v42 = vsel %vm247_vm15, %v237_v27, %v246_v41 }
 0x1cf   :  { %v249_v43 = vmul.f32 0.0625, %v248_v42 }
 0x1d1   :  { %352 = vmatmul.msk.f32.vlgmr.msra.gmra.mxu1 %vm123_vm1, %v249_v43 }
 0x224   :  { %v292_v58 = vpop.permute.xlu1 %291 }
 0x225   :  { %vm293_vm1 = vcmp.eq.s32.totalorder %v288_v57, %v292_v58 }
 0x226   :  { %v353_v62 = vsel %vm293_vm1, 1.0, %v453_v61 }
 0x24e   :  { %v271_v45 = vpop.f32.mrf.mxu1 }
 0x24f   :  { %v272_v46 = vadd.f32 %v376_v44, %v271_v45 }
 0x251   :  { %v276_v47 = vsel %vm274_vm0, %v272_v46, -inf  ;;  %275 = vst.msk [vmem:[#allocation2] sm:$0x3] %vm274_vm0, %v272_v46 }
 0x252   :  { %277 = vmax.xlane.f32.xlu2 %v276_v47  ;;  %322 = dma.vmem_to_hbm [thread:$0]  %s318_s28, 32, %s320_s26, [#allocation3]  }
 0x2c5   :  { %v278_v50 = vpop.xlane.xlu2 %277 }
 0x2c6   :  { %v279_v51 = vsub.f32 %v272_v46, %v278_v50 }
 0x2c8   :  { %v280_v52 = vmul.f32 1.442695, %v279_v51 }
 0x2ca   :  { %395 = vpow2.f32 %v280_v52 }
 0x2d0   :  { %v396_v53 = vpop.eup %395 }
 0x2d1   :  { %v282_v54 = vsel %vm274_vm0, %v396_v53, 0.0 }
 0x2d2   :  { %283 = vadd.xlane.f32.xlu0 %v282_v54 }
 0x345   :  { %v284_v56 = vpop.xlane.xlu0 %283 }
 0x346   :  { %397 = vlog2.f32 %v284_v56 }
 0x34c   :  { %v398_v59 = vpop.eup %397 }
 0x34d   :  { %v286_v60 = vmul.f32 0.6931472, %v398_v59 }
 0x34f   :  { %v296_v63 = vsub.f32 %v286_v60, %v279_v51 }
 0x351   :  { %v297_v0 = vmul.f32 %v353_v62, %v296_v63 }
 0x353   :  { %v298_v1 = vsel %vm274_vm0, %v297_v0, 0.0 }
 0x354   :  { %299 = vadd.xlane.f32.xlu2 %v298_v1 }
 0x3c7   :  { %v300_v2 = vpop.xlane.xlu2 %299 }
 0x3c8   :  { %v302_v3 = vsel %vm301_vm2, %v300_v2, 0.0 }
 0x3c9   :  { %v303_v4 = vrot.slane %v302_v3, 4 }
 0x3cb   :  { %v304_v5 = vadd.f32 %v303_v4, %v302_v3 }
 0x3cd   :  { %v305_v6 = vrot.slane %v304_v5, 2 }
 0x3cf   :  { %v306_v7 = vadd.f32 %v305_v6, %v304_v5 }
 0x3d1   :  { %v307_v8 = vrot.slane %v306_v7, 1 }
 0x3d3   :  { %v308_v9 = vadd.f32 %v307_v8, %v306_v7 }
 0x3d5   :  { %v309_v10 = vmul.f32 0.5, %v308_v9 }
 0x3d7   :  { %311 = vst.msk [vmem:[#allocation4] sm:$0x1] %vm310_vm3, %v309_v10 }
 0x3d8   :  { %333 = dma.vmem_to_hbm [thread:$0]  %s329_s30, 16, %s331_s3, [#allocation5]  }
 0x3d9   :  { %447 = dma.done.wait [#allocation3], 32  }
 0x3da   :  { %448 = vsyncadd [#allocation3], 4294967264 }
 0x3db   :  { %449 = dma.done.wait [#allocation5], 16  }
 0x3dc   :  { %450 = vsyncadd [#allocation5], 4294967280 }
 0x3dd   :  { %342 = vsyncpa [#allocation3], 1 }
 0x3de   :  { %343 = vsyncpa [#allocation5], 1 }

</bundles_post_ra>
